<compile_context>
chip_gen: v7x
topology: tpu7x:2x2x1
jax: 0.10.0
libtpu: 0.0.40
codegen_flags: <defaults>
</compile_context>

<pallas_src>
import functools

import jax
import jax.numpy as jnp
from jax.experimental import pallas as pl
from jax.experimental.pallas import tpu as pltpu


def _tconv_glu_kernel(x_ref, w_ref, b_ref, o_ref, *,
                      KT, C_in, C_out, N, B_blk, L_blk, lane_tiled,
                      compute_dtype):
    # x_ref: [B_blk, C_in, X_len]       (T,N) flattened on lanes (+ pad lanes)
    # w_ref: [KT, 2*C_out, C_in]        w_ref[kt, o, c] == torch weight[o, c, kt, 0]
    # b_ref: [2*C_out, 1]               f32
    # o_ref: [B_blk, C_out, L_blk]      L_blk lanes of the padded (T_out*N) plane
    if lane_tiled:
        base = pl.multiple_of(pl.program_id(1) * L_blk, 128)
    else:
        base = 0   # single lane block per batch -> fully static slicing

    bias = b_ref[...].astype(jnp.float32)                       # [2*C_out, 1]

    for bb in range(B_blk):                                      # small, static
        acc = None
        res = None
        # A temporal shift of kt frames == lane shift of kt*N in the flattened
        # (T*N) axis, so each tap is a contiguous lane-dense slice; contract it
        # directly on the MXU (no im2col staging through VMEM).
        for kt in range(KT):
            tap = x_ref[bb, :, pl.ds(base + kt * N, L_blk)]       # [C_in, L_blk]
            part = jnp.dot(w_ref[kt].astype(compute_dtype),
                           tap.astype(compute_dtype),
                           preferred_element_type=jnp.float32)    # [2*C_out, L_blk]
            acc = part if acc is None else acc + part
            res = tap   # kt == KT-1 window == residual x[:, :, KT-1:, :]

        # GLU epilogue in f32 (v5e has no bf16 VPU/EUP); residual kept in the
        # input's original precision (no bf16 rounding of x_in).
        p = acc[:C_out] + bias[:C_out] + res.astype(jnp.float32)
        q = acc[C_out:] + bias[C_out:]
        o_ref[bb] = (p * jnp.tanh(q)).astype(o_ref.dtype)


def temporal_conv_glu(x, weight, bias, KT, *, compute_dtype=None):
    """Temporal_conv_layer forward, act_fun='GLU', c_in == c_out.

    x:      [B, C_in, T, N]          (NCHW, same as the PyTorch module)
    weight: [2*C_out, C_in, KT, 1]   (PyTorch OIHW Conv2d weight)
    bias:   [2*C_out]
    compute_dtype: dtype of the MXU operands (cast in-kernel; worthwhile on
                   v6e/v7x only when C_in >= 8).  Accumulation, residual,
                   epilogue and output stay float32/x.dtype.
    Returns [B, C_out, T-KT+1, N] (NCHW).
    """
    B, C_in, T, N = x.shape
    two_co = weight.shape[0]
    C_out = two_co // 2
    assert C_in == C_out, "kernel implements the c_in == c_out configuration"
    T_out = T - KT + 1
    L_total = T_out * N
    L_pad = ((L_total + 127) // 128) * 128        # lane-dense, unmasked stores
    if compute_dtype is None:
        compute_dtype = x.dtype

    # FREE reshape (adjacent dims): lanes become T*N.  Pad the lane axis only
    # when T_out*N isn't already 128-aligned so every tap read stays in-bounds.
    X_len = L_pad + (KT - 1) * N
    x_k = x.reshape(B, C_in, T * N)
    if X_len != T * N:
        x_k = jnp.pad(x_k, ((0, 0), (0, 0), (0, X_len - T * N)))

    # Tiny weight shuffle: [2C_out, C_in, KT, 1] -> [KT, 2C_out, C_in].
    w_k = jnp.transpose(weight[..., 0], (2, 0, 1)).astype(compute_dtype)
    b_k = bias.reshape(two_co, 1).astype(jnp.float32)

    # Lane-block size: largest 128-multiple dividing the padded plane, capped
    # at 1024 so double-buffered tiles fit v7x's 64 MiB VMEM with headroom.
    L_blk = 128
    for cand in (1024, 512, 256, 128):
        if L_pad % cand == 0:
            L_blk = cand
            break
    n_lblk = L_pad // L_blk
    lane_tiled = n_lblk > 1

    # Fold batch elements into one grid step when the lane block is small, so
    # per-step work (>= ~512 output lanes) hides the pipeline step overhead.
    B_blk = 1
    if L_blk < 512:
        for cand in (8, 4, 2):
            if B % cand == 0 and cand * L_blk <= 2048:
                B_blk = cand
                break
    n_bblk = B // B_blk

    kernel = functools.partial(
        _tconv_glu_kernel, KT=KT, C_in=C_in, C_out=C_out, N=N,
        B_blk=B_blk, L_blk=L_blk, lane_tiled=lane_tiled,
        compute_dtype=compute_dtype)

    # NOTE: the x block index is constant in j, so Pallas does not re-DMA it per
    # lane block.  For very large T*N on v7x, pipeline_mode=pl.Buffered(...) or
    # a manual pl.ANY + async-copy of the row would also drop the second buffer.
    out_k = pl.pallas_call(
        kernel,
        out_shape=jax.ShapeDtypeStruct((B, C_out, L_pad), x.dtype),
        grid_spec=pltpu.PrefetchScalarGridSpec(
            num_scalar_prefetch=0,
            grid=(n_bblk, n_lblk),
            in_specs=[
                # full (padded T*N) rows for B_blk batch elements
                pl.BlockSpec((B_blk, C_in, X_len), lambda b, j: (b, 0, 0)),
                pl.BlockSpec((KT, two_co, C_in), lambda b, j: (0, 0, 0)),
                pl.BlockSpec((two_co, 1), lambda b, j: (0, 0)),
            ],
            out_specs=pl.BlockSpec((B_blk, C_out, L_blk),
                                   lambda b, j: (b, 0, j)),
        ),
        compiler_params=pltpu.CompilerParams(
            # Keep megacore (v7x) sharding on the batch axis: the lane-block
            # axis re-reads the same full x row, so splitting it across cores
            # would double the x HBM traffic of this memory-bound op.
            dimension_semantics=("parallel", "arbitrary")),
    )(x_k, w_k, b_k)

    # Drop lane padding (no-op when already aligned), back to NCHW.
    return out_k[:, :, :L_total].reshape(B, C_out, T_out, N)


def _reference(x, weight, bias, KT):
    """Pure-JAX reference of the PyTorch GLU forward (c_in == c_out)."""
    C_out = weight.shape[0] // 2
    x_conv = jax.lax.conv_general_dilated(
        x, weight, window_strides=(1, 1), padding="VALID",
        dimension_numbers=("NCHW", "OIHW", "NCHW"))
    x_conv = x_conv + bias[None, :, None, None]
    x_in = x[:, :, KT - 1:, :]
    return (x_conv[:, :C_out] + x_in) * jnp.tanh(x_conv[:, C_out:])


if __name__ == "__main__":
    B, C, T, N, KT = 2, 4, 16, 16, 3   # in_channels == out_channels == 4

    key = jax.random.PRNGKey(0)
    kx, kw, kb = jax.random.split(key, 3)
    x = jax.random.normal(kx, (B, C, T, N), dtype=jnp.float32)
    # deterministic synthetic Conv2d params: weight [2*C_out, C_in, KT, 1], bias [2*C_out]
    weight = 0.1 * jax.random.normal(kw, (2 * C, C, KT, 1), dtype=jnp.float32)
    bias = 0.1 * jax.random.normal(kb, (2 * C,), dtype=jnp.float32)

    ref = jax.block_until_ready(_reference(x, weight, bias, KT))

    # f32 path: matches the PyTorch forward numerics.
    out = jax.block_until_ready(temporal_conv_glu(x, weight, bias, KT))
    assert out.shape == (B, C, T - KT + 1, N), out.shape
    assert jnp.allclose(out, ref, rtol=1e-5, atol=1e-5), float(
        jnp.max(jnp.abs(out - ref)))

    # Optional bf16-MXU-operand path (cast happens in-kernel; residual and
    # epilogue stay f32).  Only a bandwidth win for C_in >= 8 — exercised here
    # purely as a correctness check of the mixed-precision path.
    out_bf16 = jax.block_until_ready(
        temporal_conv_glu(x, weight, bias, KT, compute_dtype=jnp.bfloat16))
    assert out_bf16.shape == (B, C, T - KT + 1, N), out_bf16.shape
    assert jnp.allclose(out_bf16, ref, rtol=5e-2, atol=5e-2), float(
        jnp.max(jnp.abs(out_bf16 - ref)))

    print("KERNEL_OK")
</pallas_src>

<mosaic_0001>
module attributes {stable_mosaic.version = 11 : i64} {
  func.func @_tconv_glu_kernel(%arg0: i32, %arg1: i32, %arg2: memref<2x4x288xf32, #tpu.memory_space<vmem>>, %arg3: memref<3x8x4xf32, #tpu.memory_space<vmem>>, %arg4: memref<8x1xf32, #tpu.memory_space<vmem>>, %arg5: memref<2x4x256xf32, #tpu.memory_space<vmem>>) attributes {dimension_semantics = [#tpu.dimension_semantics<parallel>, #tpu.dimension_semantics<arbitrary>], iteration_bounds = array<i64: 1, 1>, scalar_prefetch = 0 : i64, scratch_operands = 0 : i64, tpu.core_type = #tpu.core_type<tc>, window_params = [{transform_indices = @transform_0, window_bounds = array<i64: 2, 4, 288>}, {pipeline_mode = #tpu.pipeline_mode<synchronous>, transform_indices = @transform_1, window_bounds = array<i64: 3, 8, 4>}, {pipeline_mode = #tpu.pipeline_mode<synchronous>, transform_indices = @transform_2, window_bounds = array<i64: 8, 1>}, {transform_indices = @transform_3, window_bounds = array<i64: 2, 4, 256>}]} {
    %c0 = arith.constant 0 : index
    %c0_0 = arith.constant 0 : index
    %0 = vector.load %arg4[%c0, %c0_0] : memref<8x1xf32, #tpu.memory_space<vmem>>, vector<8x1xf32>
    %c0_1 = arith.constant 0 : index
    %c0_2 = arith.constant 0 : index
    %c0_3 = arith.constant 0 : index
    %1 = vector.load %arg2[%c0_1, %c0_2, %c0_3] : memref<2x4x288xf32, #tpu.memory_space<vmem>>, vector<1x4x256xf32>
    %2 = vector.shape_cast %1 : vector<1x4x256xf32> to vector<4x256xf32>
    %c0_4 = arith.constant 0 : index
    %c0_5 = arith.constant 0 : index
    %c0_6 = arith.constant 0 : index
    %3 = vector.load %arg3[%c0_4, %c0_5, %c0_6] : memref<3x8x4xf32, #tpu.memory_space<vmem>>, vector<1x8x4xf32>
    %4 = vector.shape_cast %3 : vector<1x8x4xf32> to vector<8x4xf32>
    %cst = arith.constant dense<0.000000e+00> : vector<8x256xf32>
    %5 = tpu.matmul %4, %2, %cst {dimension_numbers = #tpu.dot_dimension_numbers<[1], [0], [0], [1], [0, 0, 1, 1], [], []>} : vector<8x4xf32>, vector<4x256xf32>, vector<8x256xf32> -> vector<8x256xf32>
    %c0_7 = arith.constant 0 : index
    %c0_8 = arith.constant 0 : index
    %c16 = arith.constant 16 : index
    %6 = vector.load %arg2[%c0_7, %c0_8, %c16] : memref<2x4x288xf32, #tpu.memory_space<vmem>>, vector<1x4x256xf32>
    %7 = vector.shape_cast %6 : vector<1x4x256xf32> to vector<4x256xf32>
    %c1 = arith.constant 1 : index
    %c0_9 = arith.constant 0 : index
    %c0_10 = arith.constant 0 : index
    %8 = vector.load %arg3[%c1, %c0_9, %c0_10] : memref<3x8x4xf32, #tpu.memory_space<vmem>>, vector<1x8x4xf32>
    %9 = vector.shape_cast %8 : vector<1x8x4xf32> to vector<8x4xf32>
    %cst_11 = arith.constant dense<0.000000e+00> : vector<8x256xf32>
    %10 = tpu.matmul %9, %7, %cst_11 {dimension_numbers = #tpu.dot_dimension_numbers<[1], [0], [0], [1], [0, 0, 1, 1], [], []>} : vector<8x4xf32>, vector<4x256xf32>, vector<8x256xf32> -> vector<8x256xf32>
    %11 = arith.addf %5, %10 : vector<8x256xf32>
    %c0_12 = arith.constant 0 : index
    %c0_13 = arith.constant 0 : index
    %c32 = arith.constant 32 : index
    %12 = vector.load %arg2[%c0_12, %c0_13, %c32] : memref<2x4x288xf32, #tpu.memory_space<vmem>>, vector<1x4x256xf32>
    %13 = vector.shape_cast %12 : vector<1x4x256xf32> to vector<4x256xf32>
    %c2 = arith.constant 2 : index
    %c0_14 = arith.constant 0 : index
    %c0_15 = arith.constant 0 : index
    %14 = vector.load %arg3[%c2, %c0_14, %c0_15] : memref<3x8x4xf32, #tpu.memory_space<vmem>>, vector<1x8x4xf32>
    %15 = vector.shape_cast %14 : vector<1x8x4xf32> to vector<8x4xf32>
    %cst_16 = arith.constant dense<0.000000e+00> : vector<8x256xf32>
    %16 = tpu.matmul %15, %13, %cst_16 {dimension_numbers = #tpu.dot_dimension_numbers<[1], [0], [0], [1], [0, 0, 1, 1], [], []>} : vector<8x4xf32>, vector<4x256xf32>, vector<8x256xf32> -> vector<8x256xf32>
    %17 = arith.addf %11, %16 : vector<8x256xf32>
    %18 = vector.extract_strided_slice %17 {offsets = [0, 0], sizes = [4, 256], strides = [1, 1]} : vector<8x256xf32> to vector<4x256xf32>
    %19 = vector.extract_strided_slice %0 {offsets = [0, 0], sizes = [4, 1], strides = [1, 1]} : vector<8x1xf32> to vector<4x1xf32>
    %20 = vector.broadcast %19 : vector<4x1xf32> to vector<4x256xf32>
    %21 = arith.addf %18, %20 : vector<4x256xf32>
    %22 = arith.addf %21, %13 : vector<4x256xf32>
    %23 = vector.extract_strided_slice %17 {offsets = [4, 0], sizes = [4, 256], strides = [1, 1]} : vector<8x256xf32> to vector<4x256xf32>
    %24 = vector.extract_strided_slice %0 {offsets = [4, 0], sizes = [4, 1], strides = [1, 1]} : vector<8x1xf32> to vector<4x1xf32>
    %25 = vector.broadcast %24 : vector<4x1xf32> to vector<4x256xf32>
    %26 = arith.addf %23, %25 : vector<4x256xf32>
    %27 = math.tanh %26 : vector<4x256xf32>
    %28 = arith.mulf %22, %27 : vector<4x256xf32>
    %c0_17 = arith.constant 0 : index
    %c0_18 = arith.constant 0 : index
    %c0_19 = arith.constant 0 : index
    %29 = vector.load %arg5[%c0_17, %c0_18, %c0_19] : memref<2x4x256xf32, #tpu.memory_space<vmem>>, vector<1x4x256xf32>
    %30 = vector.shape_cast %29 : vector<1x4x256xf32> to vector<4x256xf32>
    %31 = vector.shape_cast %28 : vector<4x256xf32> to vector<1x4x256xf32>
    tpu.vector_store %arg5[%c0_17, %c0_18, %c0_19], %31 {strides = array<i32>} : memref<2x4x256xf32, #tpu.memory_space<vmem>>, vector<1x4x256xf32>,
    %c1_20 = arith.constant 1 : index
    %c0_21 = arith.constant 0 : index
    %c0_22 = arith.constant 0 : index
    %32 = vector.load %arg2[%c1_20, %c0_21, %c0_22] : memref<2x4x288xf32, #tpu.memory_space<vmem>>, vector<1x4x256xf32>
    %33 = vector.shape_cast %32 : vector<1x4x256xf32> to vector<4x256xf32>
    %c0_23 = arith.constant 0 : index
    %c0_24 = arith.constant 0 : index
    %c0_25 = arith.constant 0 : index
    %34 = vector.load %arg3[%c0_23, %c0_24, %c0_25] : memref<3x8x4xf32, #tpu.memory_space<vmem>>, vector<1x8x4xf32>
    %35 = vector.shape_cast %34 : vector<1x8x4xf32> to vector<8x4xf32>
    %cst_26 = arith.constant dense<0.000000e+00> : vector<8x256xf32>
    %36 = tpu.matmul %35, %33, %cst_26 {dimension_numbers = #tpu.dot_dimension_numbers<[1], [0], [0], [1], [0, 0, 1, 1], [], []>} : vector<8x4xf32>, vector<4x256xf32>, vector<8x256xf32> -> vector<8x256xf32>
    %c1_27 = arith.constant 1 : index
    %c0_28 = arith.constant 0 : index
    %c16_29 = arith.constant 16 : index
    %37 = vector.load %arg2[%c1_27, %c0_28, %c16_29] : memref<2x4x288xf32, #tpu.memory_space<vmem>>, vector<1x4x256xf32>
    %38 = vector.shape_cast %37 : vector<1x4x256xf32> to vector<4x256xf32>
    %c1_30 = arith.constant 1 : index
    %c0_31 = arith.constant 0 : index
    %c0_32 = arith.constant 0 : index
    %39 = vector.load %arg3[%c1_30, %c0_31, %c0_32] : memref<3x8x4xf32, #tpu.memory_space<vmem>>, vector<1x8x4xf32>
    %40 = vector.shape_cast %39 : vector<1x8x4xf32> to vector<8x4xf32>
    %cst_33 = arith.constant dense<0.000000e+00> : vector<8x256xf32>
    %41 = tpu.matmul %40, %38, %cst_33 {dimension_numbers = #tpu.dot_dimension_numbers<[1], [0], [0], [1], [0, 0, 1, 1], [], []>} : vector<8x4xf32>, vector<4x256xf32>, vector<8x256xf32> -> vector<8x256xf32>
    %42 = arith.addf %36, %41 : vector<8x256xf32>
    %c1_34 = arith.constant 1 : index
    %c0_35 = arith.constant 0 : index
    %c32_36 = arith.constant 32 : index
    %43 = vector.load %arg2[%c1_34, %c0_35, %c32_36] : memref<2x4x288xf32, #tpu.memory_space<vmem>>, vector<1x4x256xf32>
    %44 = vector.shape_cast %43 : vector<1x4x256xf32> to vector<4x256xf32>
    %c2_37 = arith.constant 2 : index
    %c0_38 = arith.constant 0 : index
    %c0_39 = arith.constant 0 : index
    %45 = vector.load %arg3[%c2_37, %c0_38, %c0_39] : memref<3x8x4xf32, #tpu.memory_space<vmem>>, vector<1x8x4xf32>
    %46 = vector.shape_cast %45 : vector<1x8x4xf32> to vector<8x4xf32>
    %cst_40 = arith.constant dense<0.000000e+00> : vector<8x256xf32>
    %47 = tpu.matmul %46, %44, %cst_40 {dimension_numbers = #tpu.dot_dimension_numbers<[1], [0], [0], [1], [0, 0, 1, 1], [], []>} : vector<8x4xf32>, vector<4x256xf32>, vector<8x256xf32> -> vector<8x256xf32>
    %48 = arith.addf %42, %47 : vector<8x256xf32>
    %49 = vector.extract_strided_slice %48 {offsets = [0, 0], sizes = [4, 256], strides = [1, 1]} : vector<8x256xf32> to vector<4x256xf32>
    %50 = vector.extract_strided_slice %0 {offsets = [0, 0], sizes = [4, 1], strides = [1, 1]} : vector<8x1xf32> to vector<4x1xf32>
    %51 = vector.broadcast %50 : vector<4x1xf32> to vector<4x256xf32>
    %52 = arith.addf %49, %51 : vector<4x256xf32>
    %53 = arith.addf %52, %44 : vector<4x256xf32>
    %54 = vector.extract_strided_slice %48 {offsets = [4, 0], sizes = [4, 256], strides = [1, 1]} : vector<8x256xf32> to vector<4x256xf32>
    %55 = vector.extract_strided_slice %0 {offsets = [4, 0], sizes = [4, 1], strides = [1, 1]} : vector<8x1xf32> to vector<4x1xf32>
    %56 = vector.broadcast %55 : vector<4x1xf32> to vector<4x256xf32>
    %57 = arith.addf %54, %56 : vector<4x256xf32>
    %58 = math.tanh %57 : vector<4x256xf32>
    %59 = arith.mulf %53, %58 : vector<4x256xf32>
    %c1_41 = arith.constant 1 : index
    %c0_42 = arith.constant 0 : index
    %c0_43 = arith.constant 0 : index
    %60 = vector.load %arg5[%c1_41, %c0_42, %c0_43] : memref<2x4x256xf32, #tpu.memory_space<vmem>>, vector<1x4x256xf32>
    %61 = vector.shape_cast %60 : vector<1x4x256xf32> to vector<4x256xf32>
    %62 = vector.shape_cast %59 : vector<4x256xf32> to vector<1x4x256xf32>
    tpu.vector_store %arg5[%c1_41, %c0_42, %c0_43], %62 {strides = array<i32>} : memref<2x4x256xf32, #tpu.memory_space<vmem>>, vector<1x4x256xf32>,
    return
  }
  func.func @transform_0(%arg0: i32, %arg1: i32) -> (i32, i32, i32) {
    %c0_i32 = arith.constant 0 : i32
    %c0_i32_0 = arith.constant 0 : i32
    %c0_i32_1 = arith.constant 0 : i32
    return %arg0, %c0_i32, %c0_i32_0 : i32, i32, i32
  }
  func.func @transform_1(%arg0: i32, %arg1: i32) -> (i32, i32, i32) {
    %c0_i32 = arith.constant 0 : i32
    %c0_i32_0 = arith.constant 0 : i32
    %c0_i32_1 = arith.constant 0 : i32
    %c0_i32_2 = arith.constant 0 : i32
    return %c0_i32, %c0_i32_0, %c0_i32_1 : i32, i32, i32
  }
  func.func @transform_2(%arg0: i32, %arg1: i32) -> (i32, i32) {
    %c0_i32 = arith.constant 0 : i32
    %c0_i32_0 = arith.constant 0 : i32
    %c0_i32_1 = arith.constant 0 : i32
    return %c0_i32, %c0_i32_0 : i32, i32
  }
  func.func @transform_3(%arg0: i32, %arg1: i32) -> (i32, i32, i32) {
    %c0_i32 = arith.constant 0 : i32
    %c0_i32_0 = arith.constant 0 : i32
    return %arg0, %c0_i32, %arg1 : i32, i32, i32
  }
}

</mosaic_0001>

<bundles_post_ra>
// kernel: tpu_custom_call.1
= control target key start
LH: loop header
LB: loop body
LE: loop exit
PB: predicated region body
PF: predicated region fallthrough
CT: control target
= control target key end

     0   :  { %s693_s16 = smov 112   ;;  %s784_s0 = inlined_call_operand.vmem [shape: f32[2,4,288], index: 0, kind: input, shape index: {}]   ;;  %s785_s1 = inlined_call_operand.vmem [shape: f32[3,8,4], index: 1, kind: input, shape index: {}]   ;;  %s786_s2 = inlined_call_operand.vmem [shape: f32[8,1], index: 2, kind: input, shape index: {}]   ;;  %s787_s3 = inlined_call_operand.hbm [shape: f32[2,4,256], index: 3, kind: output, shape index: {}]  }
   0x1   :  { %v628_v0 = vld [vmem:[%s784_s0 + $0xc] sm:$0xff]  ;;  %v16_v1 = vld [vmem:[%s784_s0] sm:$0xff] }
   0x2   :  { %v320_v2 = vcombine.high %v628_v0, %v628_v0  ;;  %v23_v3 = vcombine.high %v16_v1, %v16_v1 }
   0x4   :  { %323 = vrot.lane.b32.xlu1 %v320_v2, %s693_s16  ;;  %26 = vrot.lane.b32.xlu0 %v23_v3, %s693_s16 }
   0x5   :  { %8 = vsyncpa [#allocation3], 0  ;;  %v629_v4 = vld [vmem:[%s784_s0 + $0x14] sm:$0xf]  ;;  %v18_v5 = vld [vmem:[%s784_s0 + $0x8] sm:$0xf] }
   0x6   :  { %v694_v6 = vmov 0.0   ;;  %v192_v7 = vld [vmem:[%s784_s0 + $0x8] sm:$0xf]  ;;  %s695_s23 = smov 96   ;;  %v638_v8 = vld [vmem:[%s784_s0 + $0x14] sm:$0xf] }
   0x7   :  { %106 = vmatprep.mubr.f32.mxu0 %v694_v6  ;;  %400 = vmatprep.mubr.f32.mxu1 %v694_v6  ;;  %v696_v9 = vmov 0   ;;  %v15_v10 = vld [vmem:[%s786_s2] sm:$0xff]  ;;  %vm30_vm0 = vcmask 916480   ;;  %vm37_vm1 = vcmask 1043456   ;;  %v617_v19 = vld [vmem:[%s785_s1 + $0x8] sm:$0xff]  ;;  %vm33_vm2 = vcmask 31744  }
   0x8   :  { %325 = vrot.lane.b32.xlu1 %v629_v4, %s693_s16  ;;  %28 = vrot.lane.b32.xlu0 %v18_v5, %s693_s16  ;;  %vm204_vm3 = vcmask 785408   ;;  %v17_v27 = vld [vmem:[%s785_s1] sm:$0xff]  ;;  %v624_v33 = vld [vmem:[%s785_s1 + $0x10] sm:$0xff]  ;;  %s697_s1 = smov [#allocation2]  }
   0x9   :  { %658 = vset.pattern.permute.xlu0 %v696_v9  ;;  %s606_s5 = sshll.u32 %s697_s1, 4  ;;  %s607_s5 = int_to_ptr.vmem [resolvable:$true] %s606_s5 }
   0xa   :  { %s669_s6 = scalar_lea.vmem %s607_s5, 256  ;;  %p674_p1 = scmp.lt.s32.totalorder %s607_s5, %s607_s5 }
   0xb   :  { %p670_p0 = scmp.ne.s32.totalorder %s607_s5, %s669_s6  ;;  %p675_p2 = scmp.lt.s32.totalorder %s669_s6, %s669_s6 }
   0xc   :  { %321 = vrot.lane.b32.xlu1 %v628_v0, %s693_s16  ;;  %24 = vrot.lane.b32.xlu0 %v16_v1, %s693_s16 }
   0xd   :  { %p676_p3 = por %p675_p2, %p674_p1 }
   0xf   :  { %p677_p4 = pnand %p676_p3, %p670_p0 }
  0x10   :  { %202 = vrot.lane.b32.xlu1 %v192_v7, %s695_s23  ;;  %200 = vrot.lane.b32.xlu0 %v23_v3, %s695_s23 }
  0x14   :  { %495 = vrot.lane.b32.xlu1 %v638_v8, %s695_s23  ;;  %493 = vrot.lane.b32.xlu0 %v320_v2, %s695_s23 }
  0x18   :  { %491 = vrot.lane.b32.xlu1 %v628_v0, %s695_s23  ;;  %198 = vrot.lane.b32.xlu0 %v16_v1, %s695_s23 }
  0x1c   :  { %289 = vperm.xlu0 %658, %v15_v10  }
  0x76   :  { %v324_v11 = vpop.permute.xlu1 %323  ;;  %v27_v12 = vpop.permute.xlu0 %26 }
  0x7a   :  { %v326_v13 = vpop.permute.xlu1 %325  ;;  %v29_v14 = vpop.permute.xlu0 %28 }
  0x7b   :  { %v32_v15 = vsel %vm30_vm0, %v27_v12, %v29_v14  ;;  %v328_v16 = vsel %vm30_vm0, %v324_v11, %v326_v13 }
  0x7c   :  { %618 = vmatprep.subr.msk.mxu0 %vm37_vm1, %v32_v15  ;;  %631 = vmatprep.subr.msk.mxu1 %vm37_vm1, %v328_v16 }
  0x7e   :  { %v322_v17 = vpop.permute.xlu1 %321  ;;  %v25_v18 = vpop.permute.xlu0 %24 }
  0x7f   :  { %v31_v20 = vsel %vm30_vm0, %v25_v18, %v27_v12  ;;  %v327_v21 = vsel %vm30_vm0, %v322_v17, %v324_v11 }
  0x80   :  { %619 = vmatpush1.msk.msra.mxu0 %vm37_vm1, %v31_v20  ;;  %632 = vmatpush1.msk.msra.mxu1 %vm37_vm1, %v327_v21 }
  0x81   :  { %620 = vmatmul.mubr.msk.f32.vlgmr.msra.gmra.mrb[0].mxu0 %vm33_vm2, %v617_v19  ;;  %633 = vmatmul.mubr.msk.f32.vlgmr.msra.gmra.mrb[0].mxu1 %vm33_vm2, %v617_v19 }
  0x82   :  { %v203_v22 = vpop.permute.xlu1 %202  ;;  %621 = vmatprep.subr.msk.mxu0 %vm37_vm1, %v23_v3  ;;  %v201_v23 = vpop.permute.xlu0 %200  ;;  %634 = vmatprep.subr.msk.mxu1 %vm37_vm1, %v320_v2 }
  0x83   :  { %v206_v24 = vsel %vm204_vm3, %v201_v23, %v203_v22  ;;  %622 = vmatpush1.msk.msra.mxu0 %vm37_vm1, %v16_v1  ;;  %635 = vmatpush1.msk.msra.mxu1 %vm37_vm1, %v628_v0 }
  0x84   :  { %625 = vmatprep.subr.msk.mxu0 %vm37_vm1, %v206_v24  ;;  %184 = vmatprep.mubr.f32.mxu0 %v694_v6 }
  0x85   :  { %478 = vmatprep.mubr.f32.mxu1 %v694_v6 }
  0x86   :  { %v496_v25 = vpop.permute.xlu1 %495  ;;  %v494_v26 = vpop.permute.xlu0 %493 }
  0x87   :  { %v498_v28 = vsel %vm204_vm3, %v494_v26, %v496_v25 }
  0x88   :  { %640 = vmatprep.subr.msk.mxu1 %vm37_vm1, %v498_v28 }
  0x89   :  { %623 = vmatmul.mubr.msk.f32.vlgmr.msra.gmra.mrb[0].mxu0 %vm33_vm2, %v17_v27  ;;  %636 = vmatmul.mubr.msk.f32.vlgmr.msra.gmra.mrb[0].mxu1 %vm33_vm2, %v17_v27 }
  0x8a   :  { %v492_v29 = vpop.permute.xlu1 %491  ;;  %v199_v30 = vpop.permute.xlu0 %198  ;;  %278 = vmatprep.mubr.f32.mxu0 %v694_v6  ;;  %570 = vmatprep.mubr.f32.mxu1 %v694_v6 }
  0x8b   :  { %v497_v31 = vsel %vm204_vm3, %v492_v29, %v494_v26  ;;  %v205_v32 = vsel %vm204_vm3, %v199_v30, %v201_v23 }
  0x8c   :  { %626 = vmatpush1.msk.msra.mxu0 %vm37_vm1, %v205_v32  ;;  %641 = vmatpush1.msk.msra.mxu1 %vm37_vm1, %v497_v31 }
  0x91   :  { %627 = vmatmul.mubr.msk.f32.vlgmr.msra.gmra.mrb[0].mxu0 %vm33_vm2, %v624_v33  ;;  %642 = vmatmul.mubr.msk.f32.vlgmr.msra.gmra.mrb[0].mxu1 %vm33_vm2, %v624_v33 }
  0x9b   :  { %v290_v34 = vpop.permute.xlu0 %289 }
 0x164   :  { %v280_v35 = vpop.f32.mrb[0].mxu0  ;;  %v572_v36 = vpop.f32.mrb[0].mxu1 }
 0x165   :  { %v292_v37 = vadd.f32 %v290_v34, %v280_v35  ;;  %v579_v38 = vadd.f32 %v572_v36, %v290_v34  ;;  %v282_v39 = vpop.f32.mrb[1].mxu0  ;;  %v574_v40 = vpop.f32.mrb[1].mxu1 }
 0x166   :  { %v293_v41 = vadd.f32 %v290_v34, %v282_v39  ;;  %v580_v42 = vadd.f32 %v574_v40, %v290_v34 }
 0x167   :  { %661 = vtanh.f32 %v292_v37  ;;  %v296_v45 = vadd.f32 %v292_v37, %v205_v32  ;;  %v583_v48 = vadd.f32 %v579_v38, %v497_v31 }
 0x168   :  { %663 = vtanh.f32 %v579_v38  ;;  %v297_v52 = vadd.f32 %v293_v41, %v206_v24  ;;  %v584_v55 = vadd.f32 %v580_v42, %v498_v28 }
 0x169   :  { %665 = vtanh.f32 %v293_v41 }
 0x16a   :  { %667 = vtanh.f32 %v580_v42 }
 0x171   :  { %v662_v43 = vpop.eup %661 }
 0x172   :  { %v664_v44 = vpop.eup %663  ;;  %v302_v46 = vrot.slane %v662_v43, 4 }
 0x173   :  { %v666_v47 = vpop.eup %665  ;;  %v589_v49 = vrot.slane %v664_v44, 4 }
 0x174   :  { %v668_v50 = vpop.eup %667  ;;  %v306_v51 = vmul.f32 %v302_v46, %v296_v45  ;;  %v303_v53 = vrot.slane %v666_v47, 4 }
 0x175   :  { %v593_v54 = vmul.f32 %v589_v49, %v583_v48  ;;  %v590_v56 = vrot.slane %v668_v50, 4 }
 0x176   :  { %v307_v57 = vmul.f32 %v303_v53, %v297_v52 }
 0x177   :  { %v594_v58 = vmul.f32 %v590_v56, %v584_v55 }
 0x178   :  { %v310_v59 = vcombine.low %v306_v51, %v307_v57 }
 0x179   :  { %v597_v60 = vcombine.low %v593_v54, %v594_v58 }
 0x17a   :  { %312 = vst [vmem:[#allocation2] sm:$0xff] %v310_v59 }
 0x17b   :  { %600 = vst [vmem:[#allocation2 + $0x8] sm:$0xff] %v597_v60 }
 0x17c   :  { %680 = shalt.err (!%p677_p4)
}
 0x17d   :  { %s681_s9 = scalar_lea.hbm %s787_s3, 256 }
 0x17e   :  { %p682_p5 = scmp.ne.s32.totalorder %s787_s3, %s681_s9  ;;  %p685_p6 = scmp.lt.u32.totalorder %s681_s9, %s787_s3 }
 0x180   :  { %p687_p7 = pnand %p685_p6, %p682_p5 }
 0x182   :  { %690 = shalt.err (!%p687_p7)
}
 0x183   :  { %s698_s14 = smov 128   ;;  %s699_s15 = smov 8  }
 0x184   :  { %612 = dma.vmem_to_hbm [thread:$0]  %s607_s5, 256, %s787_s3, [#allocation3], %s698_s14, %s698_s14, %s699_s15  }
 0x185   :  { %691 = dma.done.wait [#allocation3], 256  }
 0x186   :  { %692 = vsyncadd [#allocation3], 4294967040 }
 0x187   :  { %616 = vsyncpa [#allocation3], 1 }

</bundles_post_ra>
